<compile_context>
chip_gen: v7x
topology: tpu7x:2x2x1
jax: 0.10.0
libtpu: 0.0.40
codegen_flags: <defaults>
</compile_context>

<pallas_src>
import functools

import jax
import jax.numpy as jnp
from jax.experimental import pallas as pl
from jax.experimental.pallas import tpu as pltpu

gender_dict = {'M': 0, 'F': 1}
spk_dict = {'Ses01M': 0, 'Ses01F': 1, 'Ses02M': 2, 'Ses02F': 3, 'Ses03M': 4,
            'Ses03F': 5, 'Ses04M': 6, 'Ses04F': 7, 'Ses05M': 8, 'Ses05F': 9}

# fused head-logit column layout (lane-dense 128-wide slab)
N_EMO, N_SPK, N_GEN = 4, 10, 2
EMO = (0, 4)
SPK = (4, 14)
AUD = (14, 18)
PHO = (18, 22)
GEN = (22, 24)
HEAD_COLS = 128

_VMEM_LIMIT = 32 * 1024 * 1024   # v7x-safe scoped VMEM budget


def _round_up(x, m):
    return ((x + m - 1) // m) * m


# ----------------------------------------------------------------------------
# Pallas kernels
# ----------------------------------------------------------------------------
def linear_kernel(x_ref, w_ref, b_ref, o_ref):
    # (TM, K)bf16 @ (K, N)bf16 -> f32 accumulate, lane-dense N (multiple of 128)
    acc = jnp.dot(x_ref[...], w_ref[...], preferred_element_type=jnp.float32)
    o_ref[...] = acc + b_ref[...]


def xattn_dec_kernel(len_ref, emb_ref, k_ref, v_ref, dw_ref, db_ref,
                     pst_ref, plog_ref):
    # Fused: single-head cross attention + residual + decoder output proj.
    # One batch element per grid step.
    # len_ref: SMEM (B,) int32 (scalar prefetch); emb:(1,Lp,E) f32;
    # k,v:(1,T,E) bf16; dw:(E,Vp) bf16; db:(1,Vp) f32.
    b = pl.program_id(0)
    emb = emb_ref[0]                           # (Lp, E) f32 (residual path)
    q = emb.astype(jnp.bfloat16)               # (Lp, E) bf16 (MXU path)
    k = k_ref[0]                               # (T, E)  bf16
    v = v_ref[0]                               # (T, E)  bf16
    scale = 1.0 / float(q.shape[-1]) ** 0.5
    s = jax.lax.dot_general(q, k, (((1,), (1,)), ((), ())),
                            preferred_element_type=jnp.float32) * scale  # (Lq,T)
    length = len_ref[b]
    col = jax.lax.broadcasted_iota(jnp.int32, s.shape, 1)
    s = jnp.where(col < length, s, -1e30)      # key-padding mask, f32
    m = jnp.max(s, axis=-1, keepdims=True)
    e = jnp.exp(s - m)
    denom = jnp.sum(e, axis=-1, keepdims=True)
    p = e * pl.reciprocal(denom, approx=True)  # EUP, frees VALU slots
    attn = jnp.dot(p.astype(jnp.bfloat16), v,
                   preferred_element_type=jnp.float32)          # (Lp, E) f32
    pst = emb + attn                                            # residual
    pst_ref[0] = pst
    plog_ref[0] = (jnp.dot(pst.astype(jnp.bfloat16), dw_ref[...],
                           preferred_element_type=jnp.float32)
                   + db_ref[...])                               # (Lp, Vp) f32


def pool_heads_kernel(hid_ref, pst_ref, alen_ref, plen_ref, w_ref, b_ref,
                      apool_ref, ppool_ref, logits_ref):
    # fused: masked mean-pool(audio) + masked mean-pool(phoneme) + one
    # lane-dense head matmul covering all 5 classifier heads.
    h = hid_ref[...]                                  # (B, T, E)  f32
    ps = pst_ref[...]                                 # (B, Lp, E) f32
    al = alen_ref[...]                                # (B, 1, 1)  i32
    pln = plen_ref[...]                               # (B, 1, 1)  i32
    B, T, E = h.shape
    Lp = ps.shape[1]

    t_ids = jax.lax.broadcasted_iota(jnp.int32, (B, T, 1), 1)
    amask = (t_ids < al).astype(jnp.float32)          # (B, T, 1) lane-broadcast
    asum = jnp.sum(h * amask, axis=1)                 # (B, E)
    acnt = jnp.maximum(jnp.sum(amask, axis=1), 1.0)   # (B, 1); no NaN if len==0
    apool = asum * pl.reciprocal(acnt, approx=True)
    apool_ref[...] = apool

    p_ids = jax.lax.broadcasted_iota(jnp.int32, (B, Lp, 1), 1)
    pmask = (p_ids < pln).astype(jnp.float32)
    psum = jnp.sum(ps * pmask, axis=1)
    pcnt = jnp.maximum(jnp.sum(pmask, axis=1), 1.0)
    ppool = psum * pl.reciprocal(pcnt, approx=True)
    ppool_ref[...] = ppool

    fused = jnp.concatenate([apool, ppool], axis=-1).astype(jnp.bfloat16)  # (B,2E)
    logits_ref[...] = (jnp.dot(fused, w_ref[...],
                               preferred_element_type=jnp.float32)
                       + b_ref[...])


def losses_kernel(plog_ref, ptgt_ref, hlog_ref, lab_ref, spk_ref, gen_ref,
                  out_ref, *, v_classes, emo_sl, spk_sl, aud_sl, pho_sl,
                  gen_sl):
    # All CE / entropy losses in one launch; 8 scalars written to SMEM.
    def ce(logits, targets, lo, hi, ignore_index=None):
        R, C = logits.shape
        col = jax.lax.broadcasted_iota(jnp.int32, (R, C), 1)
        valid = (col >= lo) & (col < hi)
        z = jnp.where(valid, logits, -1e30)
        m = jnp.max(z, axis=-1, keepdims=True)
        lse = jnp.log(jnp.sum(jnp.exp(z - m), axis=-1, keepdims=True)) + m
        onehot = col == (targets + lo)                       # iota==target
        logit_t = jnp.sum(jnp.where(onehot, logits, 0.0), axis=-1,
                          keepdims=True)
        nll = lse - logit_t                                  # (R, 1)
        if ignore_index is not None:
            w = jnp.where(targets == ignore_index, 0.0, 1.0)
        else:
            w = jnp.ones_like(nll)
        num = jnp.sum(nll * w)
        den = jnp.maximum(jnp.sum(w), 1.0)                   # guard den == 0
        return num / den

    p_logits = plog_ref[...]                                 # (Np, 128) f32
    p_tgt = ptgt_ref[...]                                    # (Np, 1)   i32
    out_ref[0] = ce(p_logits, p_tgt, 0, v_classes, ignore_index=0)

    hl = hlog_ref[...]                                       # (B, 128) f32
    lab = lab_ref[...]                                       # (B, 1)   i32
    out_ref[1] = ce(hl, lab, emo_sl[0], emo_sl[1])           # loss_emo
    out_ref[2] = ce(hl, lab, aud_sl[0], aud_sl[1])           # loss_audio
    out_ref[3] = ce(hl, lab, pho_sl[0], pho_sl[1])           # loss_phoneme_head
    out_ref[4] = ce(hl, gen_ref[...], gen_sl[0], gen_sl[1])  # loss_gender
    out_ref[5] = ce(hl, spk_ref[...], spk_sl[0], spk_sl[1])  # loss_spk

    # mean softmax entropy over the speaker logits
    R, C = hl.shape
    col = jax.lax.broadcasted_iota(jnp.int32, (R, C), 1)
    valid = (col >= spk_sl[0]) & (col < spk_sl[1])
    z = jnp.where(valid, hl, -1e30)
    m = jnp.max(z, axis=-1, keepdims=True)
    e = jnp.exp(z - m)
    ssum = jnp.sum(e, axis=-1, keepdims=True)
    p = e * pl.reciprocal(ssum, approx=True)
    logp = (z - m) - jnp.log(ssum)
    ent = -jnp.sum(jnp.where(valid, p * logp, 0.0), axis=-1)
    out_ref[6] = jnp.sum(ent) / R                            # loss_domain
    out_ref[7] = jnp.float32(0.0)


# ----------------------------------------------------------------------------
# pallas_call wrappers
# ----------------------------------------------------------------------------
def _full_spec(shape):
    nd = len(shape)
    return pl.BlockSpec(shape, lambda i, nd=nd: (0,) * nd)


def linear(x, w, b):
    """Row-tiled (M,K)@(K,N)+b. Operands cast to bf16, f32 accumulate.

    N must be a multiple of 128 (lane-dense stores)."""
    M, K = x.shape
    N = w.shape[1]
    xb = x.astype(jnp.bfloat16)
    wb = w.astype(jnp.bfloat16)
    bf = b.reshape(1, N).astype(jnp.float32)

    TM = M
    for cand in (512, 256, 128):
        if M > cand and M % cand == 0:
            TM = cand
            break

    return pl.pallas_call(
        linear_kernel,
        grid=(M // TM,),
        in_specs=[pl.BlockSpec((TM, K), lambda i: (i, 0)),
                  pl.BlockSpec((K, N), lambda i: (0, 0)),
                  pl.BlockSpec((1, N), lambda i: (0, 0))],
        out_specs=pl.BlockSpec((TM, N), lambda i: (i, 0)),
        out_shape=jax.ShapeDtypeStruct((M, N), jnp.float32),
        compiler_params=pltpu.CompilerParams(
            dimension_semantics=("parallel",),
            vmem_limit_bytes=_VMEM_LIMIT),
    )(xb, wb, bf)


def cross_attn_decode(emb, k, v, lengths, dec_w, dec_b):
    """Fused single-head cross attention + residual + decoder projection;
    grid over batch ('parallel'), key-padding mask built in-kernel from
    lengths (scalar prefetch / SMEM)."""
    B, Lp, E = emb.shape
    T = k.shape[1]
    Vp = dec_w.shape[1]
    kb = k.astype(jnp.bfloat16)
    vb = v.astype(jnp.bfloat16)
    dwb = dec_w.astype(jnp.bfloat16)
    dbf = dec_b.reshape(1, Vp).astype(jnp.float32)
    # TODO(synk): for real audio lengths, additionally tile the T (memory) axis
    # with an online-softmax accumulator instead of one full (T, E) block.
    grid_spec = pltpu.PrefetchScalarGridSpec(
        num_scalar_prefetch=1,
        grid=(B,),
        in_specs=[pl.BlockSpec((1, Lp, E), lambda b, lens: (b, 0, 0)),
                  pl.BlockSpec((1, T, E), lambda b, lens: (b, 0, 0)),
                  pl.BlockSpec((1, T, E), lambda b, lens: (b, 0, 0)),
                  pl.BlockSpec((E, Vp), lambda b, lens: (0, 0)),
                  pl.BlockSpec((1, Vp), lambda b, lens: (0, 0))],
        out_specs=[pl.BlockSpec((1, Lp, E), lambda b, lens: (b, 0, 0)),
                   pl.BlockSpec((1, Lp, Vp), lambda b, lens: (b, 0, 0))],
    )
    return pl.pallas_call(
        xattn_dec_kernel,
        grid_spec=grid_spec,
        out_shape=(jax.ShapeDtypeStruct((B, Lp, E), jnp.float32),
                   jax.ShapeDtypeStruct((B, Lp, Vp), jnp.float32)),
        compiler_params=pltpu.CompilerParams(
            dimension_semantics=("parallel",),
            vmem_limit_bytes=_VMEM_LIMIT),
    )(lengths.astype(jnp.int32), emb.astype(jnp.float32), kb, vb, dwb, dbf)


def pool_and_heads(hidden_states, P_states, audio_length, plable_length,
                   head_w, head_b):
    B, T, E = hidden_states.shape
    Lp = P_states.shape[1]
    NH = head_w.shape[1]
    alen = audio_length.reshape(B, 1, 1).astype(jnp.int32)
    plen = plable_length.reshape(B, 1, 1).astype(jnp.int32)
    wb = head_w.astype(jnp.bfloat16)
    bf = head_b.reshape(1, NH).astype(jnp.float32)

    out_shapes = (jax.ShapeDtypeStruct((B, E), jnp.float32),
                  jax.ShapeDtypeStruct((B, E), jnp.float32),
                  jax.ShapeDtypeStruct((B, NH), jnp.float32))
    return pl.pallas_call(
        pool_heads_kernel,
        grid=(1,),
        in_specs=[_full_spec(hidden_states.shape), _full_spec(P_states.shape),
                  _full_spec(alen.shape), _full_spec(plen.shape),
                  _full_spec(wb.shape), _full_spec(bf.shape)],
        out_specs=tuple(_full_spec(s.shape) for s in out_shapes),
        out_shape=out_shapes,
        compiler_params=pltpu.CompilerParams(vmem_limit_bytes=_VMEM_LIMIT),
    )(hidden_states, P_states, alen, plen, wb, bf)


def all_losses(p_logits_pad, p_targets, head_logits, labels, id_labels,
               gender_labels, num_phoneme_classes):
    Np = p_logits_pad.shape[0]
    B = head_logits.shape[0]
    kern = functools.partial(
        losses_kernel,
        v_classes=int(num_phoneme_classes),
        emo_sl=EMO, spk_sl=SPK, aud_sl=AUD, pho_sl=PHO, gen_sl=GEN)
    return pl.pallas_call(
        kern,
        grid=(1,),
        in_specs=[_full_spec(p_logits_pad.shape), _full_spec((Np, 1)),
                  _full_spec(head_logits.shape), _full_spec((B, 1)),
                  _full_spec((B, 1)), _full_spec((B, 1))],
        out_specs=pl.BlockSpec(memory_space=pltpu.MemorySpace.SMEM),
        out_shape=jax.ShapeDtypeStruct((8,), jnp.float32),
        compiler_params=pltpu.CompilerParams(vmem_limit_bytes=_VMEM_LIMIT),
    )(p_logits_pad,
      p_targets.reshape(Np, 1).astype(jnp.int32),
      head_logits,
      labels.reshape(B, 1).astype(jnp.int32),
      id_labels.reshape(B, 1).astype(jnp.int32),
      gender_labels.reshape(B, 1).astype(jnp.int32))


# ----------------------------------------------------------------------------
# Synthetic PASER parameters + forward
# ----------------------------------------------------------------------------
def init_params(key, d_in, e, vocab, n_emo=N_EMO, n_spk=N_SPK, n_gender=N_GEN):
    ks = jax.random.split(key, 8)

    def w(k, shape, fan_in):
        return jax.random.normal(k, shape, jnp.float32) * (1.0 / float(fan_in) ** 0.5)

    vocab_pad = _round_up(vocab, 128)
    dec_w = jnp.zeros((e, vocab_pad), jnp.float32)
    dec_w = dec_w.at[:, :vocab].set(w(ks[2], (e, vocab), e))

    # fused 5-head classifier weight: [emo | spk | audio | phoneme | gender | 0-pad]
    head_w = jnp.zeros((2 * e, HEAD_COLS), jnp.float32)
    head_w = head_w.at[:, EMO[0]:EMO[1]].set(w(ks[3], (2 * e, n_emo), 2 * e))
    head_w = head_w.at[:, SPK[0]:SPK[1]].set(w(ks[4], (2 * e, n_spk), 2 * e))
    head_w = head_w.at[:e, AUD[0]:AUD[1]].set(w(ks[5], (e, n_emo), e))
    head_w = head_w.at[e:, PHO[0]:PHO[1]].set(w(ks[6], (e, n_emo), e))
    head_w = head_w.at[:e, GEN[0]:GEN[1]].set(w(ks[7], (e, n_gender), e))

    return {
        'pre_w': w(ks[0], (d_in, e), d_in),
        'pre_b': jnp.zeros((e,), jnp.float32),
        'phon_emb': jax.random.normal(ks[1], (vocab, e), jnp.float32) * 0.02,
        'dec_w': dec_w,                                  # (E, 128) lane-padded
        'dec_b': jnp.zeros((vocab_pad,), jnp.float32),
        'head_w': head_w,                                # (2E, 128) fused heads
        'head_b': jnp.zeros((HEAD_COLS,), jnp.float32),
    }


def paser_forward(params, audio, audio_length, labels, plabels, plable_length,
                  id_labels, gender_labels, now_step, sum_step,
                  num_phoneme_classes=75,
                  phoneme_weight=1.0, spk_weight=0.1, otherhead_weight=0.2,
                  fuse_mode='concat'):
    B, T, Din = audio.shape
    E = params['pre_w'].shape[1]
    V = num_phoneme_classes

    # --- self.pretrain(audio): frame-wise projection (Pallas matmul) ---------
    hidden_states = linear(audio.reshape(B * T, Din),
                           params['pre_w'], params['pre_b']).reshape(B, T, E)

    # --- schedule scalar (GRL alpha) ------------------------------------------
    p = float(now_step) / float(sum_step)
    alpha = 2.0 / (1.0 + jnp.exp(-10.0 * p)) - 1.0
    # TODO(synk): alpha only scales gradients in the gradient-reversal layer;
    # the forward pass is an identity, so alpha is unused below.
    del alpha

    # --- phoneme decoder (simplified: embed + cross-attn + output proj) ------
    # TODO(synk): the real phoneme_decoder (full transformer decoder) is not
    # provided; approximated by one cross-attention layer over the encoder
    # memory with the ~audio_padding_mask key-padding mask.
    plabels_input = plabels[:, :-1]                                     # (B, Lp)
    plabels_target = plabels[:, 1:]                                     # (B, Lp)
    Lp = plabels_input.shape[1]
    emb = params['phon_emb'][plabels_input]                             # (B, Lp, E)
    P_states, P_logits_full = cross_attn_decode(
        emb, hidden_states, hidden_states, audio_length,
        params['dec_w'], params['dec_b'])                               # (B,Lp,E), (B,Lp,128)
    P_logits_pad = P_logits_full.reshape(B * Lp, -1)                    # (B*Lp, 128)
    P_logits = P_logits_full[:, :, :V]                                  # (B, Lp, V)

    # --- emo_head: fused masked mean pools + fused 5-head matmul -------------
    audio_pooled, phon_pooled, head_logits = pool_and_heads(
        hidden_states, P_states, audio_length, plable_length,
        params['head_w'], params['head_b'])

    emo_logits = head_logits[:, EMO[0]:EMO[1]]
    sec_logits = head_logits[:, SPK[0]:SPK[1]]
    audio_logits = head_logits[:, AUD[0]:AUD[1]]
    phoneme_head_logits = head_logits[:, PHO[0]:PHO[1]]
    gender_logits = head_logits[:, GEN[0]:GEN[1]]
    del sec_logits, audio_logits, phoneme_head_logits  # losses computed in fused kernel

    # --- all losses in one fused Pallas kernel (SMEM scalar outputs) ---------
    # TODO(synk): entropy_loss is not defined in the reference; using mean
    # softmax entropy of the speaker logits.
    losses_vec = all_losses(P_logits_pad, plabels_target.reshape(-1),
                            head_logits, labels, id_labels, gender_labels, V)
    phoneme_loss = losses_vec[0]
    loss_emo = losses_vec[1]
    loss_audio = losses_vec[2]
    loss_phoneme_head = losses_vec[3]
    loss_gender = losses_vec[4]
    if fuse_mode in ('concat', 'cross'):
        loss_spk = losses_vec[5]
        loss_domain = losses_vec[6]
    else:
        loss_spk = jnp.float32(0.0)
        loss_domain = jnp.float32(0.0)

    total = (loss_emo
             + phoneme_weight * phoneme_loss
             + spk_weight * loss_domain
             + otherhead_weight * (loss_phoneme_head + loss_audio))

    return {
        'loss': total,
        'loss_spk': spk_weight * loss_spk,
        'loss_phoneme': phoneme_weight * phoneme_loss,
        'loss_emo': loss_emo,
        'loss_domain': spk_weight * loss_domain,
        'loss_audio_emo': otherhead_weight * loss_audio,
        'loss_phoneme_emo': otherhead_weight * loss_phoneme_head,
        'loss_gender': 0.0 * loss_gender,
        'head_logits': emo_logits,
        'phoneme_logits': P_logits,
        'gender_logits': gender_logits,
        'hidden_states': audio_pooled,
        'phoneme_states': phon_pooled,
        'losses': [loss_emo, phoneme_loss],
    }


# ----------------------------------------------------------------------------
if __name__ == "__main__":
    key = jax.random.PRNGKey(0)
    B, T, Din, E, V, Lp = 2, 16, 32, 128, 75, 8

    k_audio, k_plab, k_par = jax.random.split(key, 3)
    audio = jax.random.normal(k_audio, (B, T, Din), jnp.float32)
    audio_length = jnp.array([16, 12], jnp.int32)

    plabels = jax.random.randint(k_plab, (B, Lp + 1), 1, V).astype(jnp.int32)
    plabels = plabels.at[1, 7:].set(0)          # padding -> exercises ignore_index=0
    plable_length = jnp.array([8, 6], jnp.int32)

    labels = jnp.array([0, 2], jnp.int32)       # 4 emotion classes

    filenames = ["Ses01M_impro01_F000", "Ses03F_script02_M012"]
    id_labels = jnp.array([spk_dict[f.split('_')[0]] for f in filenames], jnp.int32)
    gender_labels = jnp.array([gender_dict[f.split('_')[0][-1]] for f in filenames],
                              jnp.int32)

    params = init_params(k_par, Din, E, V)

    out = paser_forward(params, audio, audio_length, labels, plabels,
                        plable_length, id_labels, gender_labels,
                        now_step=100, sum_step=1000, num_phoneme_classes=V)
    jax.block_until_ready(out)
    print("KERNEL_OK")
</pallas_src>

<mosaic_0001>
module attributes {stable_mosaic.version = 11 : i64} {
  func.func @linear_kernel(%arg0: i32, %arg1: memref<32x32xbf16, #tpu.memory_space<vmem>>, %arg2: memref<32x128xbf16, #tpu.memory_space<vmem>>, %arg3: memref<1x128xf32, #tpu.memory_space<vmem>>, %arg4: memref<32x128xf32, #tpu.memory_space<vmem>>) attributes {dimension_semantics = [#tpu.dimension_semantics<parallel>], iteration_bounds = array<i64: 1>, scalar_prefetch = 0 : i64, scratch_operands = 0 : i64, tpu.core_type = #tpu.core_type<tc>, window_params = [{transform_indices = @transform_0, window_bounds = array<i64: 32, 32>}, {pipeline_mode = #tpu.pipeline_mode<synchronous>, transform_indices = @transform_1, window_bounds = array<i64: 32, 128>}, {pipeline_mode = #tpu.pipeline_mode<synchronous>, transform_indices = @transform_2, window_bounds = array<i64: 1, 128>}, {transform_indices = @transform_3, window_bounds = array<i64: 32, 128>}]} {
    %c0 = arith.constant 0 : index
    %c0_0 = arith.constant 0 : index
    %0 = vector.load %arg1[%c0, %c0_0] : memref<32x32xbf16, #tpu.memory_space<vmem>>, vector<32x32xbf16>
    %c0_1 = arith.constant 0 : index
    %c0_2 = arith.constant 0 : index
    %1 = vector.load %arg2[%c0_1, %c0_2] : memref<32x128xbf16, #tpu.memory_space<vmem>>, vector<32x128xbf16>
    %cst = arith.constant dense<0.000000e+00> : vector<32x128xf32>
    %2 = tpu.matmul %0, %1, %cst {dimension_numbers = #tpu.dot_dimension_numbers<[1], [0], [0], [1], [0, 0, 1, 1], [], []>} : vector<32x32xbf16>, vector<32x128xbf16>, vector<32x128xf32> -> vector<32x128xf32>
    %c0_3 = arith.constant 0 : index
    %c0_4 = arith.constant 0 : index
    %3 = vector.load %arg3[%c0_3, %c0_4] : memref<1x128xf32, #tpu.memory_space<vmem>>, vector<1x128xf32>
    %4 = vector.broadcast %3 : vector<1x128xf32> to vector<32x128xf32>
    %5 = arith.addf %2, %4 : vector<32x128xf32>
    %c0_5 = arith.constant 0 : index
    %c0_6 = arith.constant 0 : index
    %6 = vector.load %arg4[%c0_5, %c0_6] : memref<32x128xf32, #tpu.memory_space<vmem>>, vector<32x128xf32>
    tpu.vector_store %arg4[%c0_5, %c0_6], %5 {strides = array<i32>} : memref<32x128xf32, #tpu.memory_space<vmem>>, vector<32x128xf32>,
    return
  }
  func.func @transform_0(%arg0: i32) -> (i32, i32) {
    %c0_i32 = arith.constant 0 : i32
    %c0_i32_0 = arith.constant 0 : i32
    return %arg0, %c0_i32 : i32, i32
  }
  func.func @transform_1(%arg0: i32) -> (i32, i32) {
    %c0_i32 = arith.constant 0 : i32
    %c0_i32_0 = arith.constant 0 : i32
    %c0_i32_1 = arith.constant 0 : i32
    return %c0_i32, %c0_i32_0 : i32, i32
  }
  func.func @transform_2(%arg0: i32) -> (i32, i32) {
    %c0_i32 = arith.constant 0 : i32
    %c0_i32_0 = arith.constant 0 : i32
    %c0_i32_1 = arith.constant 0 : i32
    return %c0_i32, %c0_i32_0 : i32, i32
  }
  func.func @transform_3(%arg0: i32) -> (i32, i32) {
    %c0_i32 = arith.constant 0 : i32
    %c0_i32_0 = arith.constant 0 : i32
    return %arg0, %c0_i32 : i32, i32
  }
}

</mosaic_0001>

<bundles_post_ra>
// kernel: tpu_custom_call.1
= control target key start
LH: loop header
LB: loop body
LE: loop exit
PB: predicated region body
PF: predicated region fallthrough
CT: control target
= control target key end

     0   :  { %8 = vsyncpa [#allocation3], 0  ;;  %s327_s0 = inlined_call_operand.hbm [shape: bf16[32,32], index: 0, kind: input, shape index: {}]   ;;  %s328_s1 = inlined_call_operand.hbm [shape: bf16[32,128], index: 1, kind: input, shape index: {}]   ;;  %s329_s2 = inlined_call_operand.vmem [shape: f32[1,128], index: 2, kind: input, shape index: {}]   ;;  %s330_s3 = inlined_call_operand.hbm [shape: f32[32,128], index: 3, kind: output, shape index: {}]  }
   0x1   :  { %9 = vsyncpa [#allocation6], 0 }
   0x2   :  { %10 = vsyncpa [#allocation4], 0  ;;  %s261_s12 = smov [#allocation2]   ;;  %s189_s16 = scalar_lea.hbm %s327_s0, 256 }
   0x3   :  { %s16_s13 = sshll.u32 %s261_s12, 4  ;;  %p190_p0 = scmp.ne.s32.totalorder %s327_s0, %s189_s16  ;;  %s17_s13 = int_to_ptr.vmem [resolvable:$true] %s16_s13 }
   0x4   :  { %p193_p1 = scmp.lt.u32.totalorder %s189_s16, %s327_s0 }
   0x6   :  { %p195_p2 = pnand %p193_p1, %p190_p0 }
   0x8   :  { %198 = shalt.err (!%p195_p2)
}
   0x9   :  { %s199_s21 = scalar_lea.vmem %s17_s13, 256  ;;  %p204_p4 = scmp.lt.s32.totalorder %s17_s13, %s17_s13 }
   0xa   :  { %p200_p3 = scmp.ne.s32.totalorder %s17_s13, %s199_s21  ;;  %p205_p5 = scmp.lt.s32.totalorder %s199_s21, %s199_s21 }
   0xc   :  { %p206_p6 = por %p205_p5, %p204_p4 }
   0xe   :  { %p207_p7 = pnand %p206_p6, %p200_p3 }
  0x10   :  { %210 = shalt.err (!%p207_p7)
}
  0x11   :  { %s262_s22 = smov 64   ;;  %s263_s23 = smov 4  }
  0x12   :  { %22 = dma.hbm_to_vmem [thread:$0]  %s327_s0, 256, %s17_s13, [#allocation3], %s262_s22, %s262_s22, %s263_s23  }
  0x13   :  { %s264_s26 = smov [#allocation5]   ;;  %s211_s30 = scalar_lea.hbm %s328_s1, 256 }
  0x14   :  { %s28_s27 = sshll.u32 %s264_s26, 4  ;;  %p212_p8 = scmp.ne.s32.totalorder %s328_s1, %s211_s30  ;;  %s29_s27 = int_to_ptr.vmem [resolvable:$true] %s28_s27 }
  0x15   :  { %p215_p9 = scmp.lt.u32.totalorder %s211_s30, %s328_s1 }
  0x17   :  { %p217_p10 = pnand %p215_p9, %p212_p8 }
  0x19   :  { %220 = shalt.err (!%p217_p10)
}
  0x1a   :  { %s221_s8 = scalar_lea.vmem %s29_s27, 256  ;;  %p226_p12 = scmp.lt.s32.totalorder %s29_s27, %s29_s27 }
  0x1b   :  { %p222_p11 = scmp.ne.s32.totalorder %s29_s27, %s221_s8  ;;  %p227_p13 = scmp.lt.s32.totalorder %s221_s8, %s221_s8 }
  0x1d   :  { %p228_p0 = por %p227_p13, %p226_p12 }
  0x1f   :  { %p229_p1 = pnand %p228_p0, %p222_p11 }
  0x21   :  { %232 = shalt.err (!%p229_p1)
}
  0x22   :  { %34 = dma.hbm_to_vmem [thread:$0]  %s328_s1, 256, %s29_s27, [#allocation6], %s262_s22, %s262_s22, %s263_s23  }
  0x23   :  { %255 = dma.done.wait [#allocation3], 256  }
  0x24   :  { %256 = vsyncadd [#allocation3], 4294967040 }
  0x25   :  { %257 = dma.done.wait [#allocation6], 256  }
  0x26   :  { %258 = vsyncadd [#allocation6], 4294967040  ;;  %v185_v0 = vld [vmem:[#allocation5] sm:$0xff]   ;;  %v186_v1 = vld [vmem:[#allocation5 + $0x8] sm:$0xff]   ;;  %vm81_vm0 = vcmask 261120   ;;  %s265_s1 = smov [#allocation7]  }
  0x27   :  { %170 = vmatprep.subr.bf16.mxu0 %v185_v0  ;;  %v187_v2 = vld [vmem:[#allocation2] sm:$0xff]   ;;  %v188_v3 = vld [vmem:[#allocation2 + $0x8] sm:$0xff]   ;;  %s146_s12 = sshll.u32 %s265_s1, 4  ;;  %s147_s12 = int_to_ptr.vmem [resolvable:$true] %s146_s12 }
  0x28   :  { %171 = vmatpush3.bf16.msra.mxu0 %v185_v0  ;;  %174 = vmatprep.mubr.msk.bf16.mxu0 %vm81_vm0, %v187_v2  ;;  %v159_v4 = vld [vmem:[%s329_s2] ss:$0 sm:$0xff]  ;;  %s233_s13 = scalar_lea.vmem %s147_s12, 512  ;;  %p238_p3 = scmp.lt.s32.totalorder %s147_s12, %s147_s12 }
  0x29   :  { %172 = vmatprep.subr.bf16.mxu0 %v186_v1  ;;  %p234_p2 = scmp.ne.s32.totalorder %s147_s12, %s233_s13  ;;  %p239_p4 = scmp.lt.s32.totalorder %s233_s13, %s233_s13 }
  0x2b   :  { %p240_p5 = por %p239_p4, %p238_p3 }
  0x2c   :  { %173 = vmatpush3.bf16.msra.mxu0 %v186_v1 }
  0x2d   :  { %p241_p6 = pnand %p240_p5, %p234_p2 }
  0x2f   :  { %175 = vmatmul.mubr.msk.bf16.vlgmr.msra.gmra.mrb[0].mxu0 %vm81_vm0, %v188_v3 }
 0x102   :  { %v176_v5 = vpop.f32.mrb[0].mxu0 }
 0x103   :  { %v131_v6 = vadd.f32 %v176_v5, %v159_v4  ;;  %v122_v7 = vpop.f32.mrb[1].mxu0 }
 0x104   :  { %v123_v8 = vadd.f32 %v159_v4, %v122_v7  ;;  %v177_v9 = vpop.f32.mrb[2].mxu0 }
 0x105   :  { %139 = vst [vmem:[#allocation7 + $0x10] sm:$0xff] %v131_v6  ;;  %v134_v10 = vadd.f32 %v177_v9, %v159_v4  ;;  %v125_v11 = vpop.f32.mrb[3].mxu0 }
 0x106   :  { %137 = vst [vmem:[#allocation7] sm:$0xff] %v123_v8  ;;  %v126_v12 = vadd.f32 %v159_v4, %v125_v11 }
 0x107   :  { %140 = vst [vmem:[#allocation7 + $0x18] sm:$0xff] %v134_v10 }
 0x108   :  { %138 = vst [vmem:[#allocation7 + $0x8] sm:$0xff] %v126_v12 }
 0x109   :  { %244 = shalt.err (!%p241_p6)
}
 0x10a   :  { %s245_s15 = scalar_lea.hbm %s330_s3, 512 }
 0x10b   :  { %p246_p7 = scmp.ne.s32.totalorder %s330_s3, %s245_s15  ;;  %p249_p8 = scmp.lt.u32.totalorder %s245_s15, %s330_s3 }
 0x10d   :  { %p251_p9 = pnand %p249_p8, %p246_p7 }
 0x10f   :  { %254 = shalt.err (!%p251_p9)
}
 0x110   :  { %s266_s20 = smov 128   ;;  %s267_s21 = smov 8  }
 0x111   :  { %152 = dma.vmem_to_hbm [thread:$0]  %s147_s12, 512, %s330_s3, [#allocation4], %s266_s20, %s266_s20, %s267_s21  }
 0x112   :  { %259 = dma.done.wait [#allocation4], 512  }
 0x113   :  { %260 = vsyncadd [#allocation4], 4294966784 }
 0x114   :  { %156 = vsyncpa [#allocation3], 1 }
 0x115   :  { %157 = vsyncpa [#allocation6], 1 }
 0x116   :  { %158 = vsyncpa [#allocation4], 1 }

</bundles_post_ra>
